<compile_context>
chip_gen: v7x
topology: tpu7x:2x2x1
jax: 0.10.0
libtpu: 0.0.40
codegen_flags: <defaults>
</compile_context>

<pallas_src>
import jax
import jax.numpy as jnp
from jax.experimental import pallas as pl
from jax.experimental.pallas import tpu as pltpu


# ----------------------------------------------------------------------------
# Fused Pallas kernel: L skewed LSTM layers x T steps + decoder, one launch.
# ----------------------------------------------------------------------------
def _make_fused_kernel(L, T, B, H, Din):
    LH = L * H          # combined hidden/cell state width (lanes)
    G = 4 * LH          # combined gate width (gate-major: [i_* | f_* | g_* | o_*])

    def kernel(x_ref, wih0_ref, wbig_ref, bias_ref, h0_ref, c0_ref,
               decw_ref, decb_ref, out_ref):
        f32 = jnp.float32

        # ------------------ Prologue (off the serial chain) ------------------
        # Layer-0 input projection for the whole sequence on the VPU with
        # broadcast FMAs (Din is tiny; avoids a K=Din MXU push / relayout).
        x = x_ref[...].astype(f32)                         # (T*B, Din)
        wih0 = wih0_ref[...].astype(f32)                   # (Din, 4H)
        gx0 = x[:, 0:1] * wih0[0:1, :]
        for d in range(1, Din):
            gx0 = gx0 + x[:, d:d + 1] * wih0[d:d + 1, :]   # (T*B, 4H)

        # Scatter layer-0's projection into the gate-major combined layout and
        # fold every layer's bias in, so the loop does exactly ONE add / step.
        pieces = []
        for q in range(4):
            pieces.append(gx0[:, q * H:(q + 1) * H])
            if L > 1:
                pieces.append(jnp.zeros((T * B, (L - 1) * H), f32))
        gx_ext = jnp.concatenate(pieces, axis=1) + bias_ref[...]      # (T*B, G)
        gx_steps = [gx_ext[t * B:(t + 1) * B, :] for t in range(T)]   # pre-sliced
        bias_b = jnp.broadcast_to(bias_ref[...], (B, G))              # drain steps

        wbig = wbig_ref[...]                               # (L*H, G)
        h = h0_ref[...].astype(f32)                        # (B, L*H)
        c = c0_ref[...].astype(f32)                        # (B, L*H)

        # Single-tanh activation: sigmoid(z)=0.5*tanh(0.5z)+0.5 on i/f/o lanes,
        # plain tanh on g lanes. Constants hoisted (one EUP pass per step).
        lanes = jax.lax.broadcasted_iota(jnp.int32, (1, G), 1)
        is_g = (lanes >= 2 * LH) & (lanes < 3 * LH)
        pre = jnp.broadcast_to(jnp.where(is_g, 1.0, 0.5).astype(f32), (B, G))
        post = jnp.broadcast_to(jnp.where(is_g, 0.0, 0.5).astype(f32), (B, G))

        # Warm-up lane mask helper (layer l lives at state lanes [l*H,(l+1)*H)).
        state_lane = jax.lax.broadcasted_iota(jnp.int32, (B, LH), 1)

        hs_out = []
        # --------- Skewed recurrence: one block-structured MXU push ----------
        # Layer l processes time step (s - l) at skewed step s, so the layer-l
        # recurrence and the layer-(l+1) feed-forward share one matmul.
        for s in range(T + L - 1):
            gsrc = gx_steps[s] if s < T else bias_b
            gates = jnp.dot(h, wbig, preferred_element_type=f32) + gsrc  # (B, G)
            act = jnp.tanh(gates * pre) * pre + post
            i_all = act[:, 0 * LH:1 * LH]
            f_all = act[:, 1 * LH:2 * LH]
            g_all = act[:, 2 * LH:3 * LH]
            o_all = act[:, 3 * LH:4 * LH]
            c_new = f_all * c + i_all * g_all
            h_new = o_all * jnp.tanh(c_new)
            if s < L - 1:
                # Warm-up: layers l > s are not live yet; keep their initial
                # h/c so they start the recurrence from the true initial state.
                keep = state_lane < (s + 1) * H
                c = jnp.where(keep, c_new, c)
                h = jnp.where(keep, h_new, h)
            else:
                # Drain-side garbage (finished layers) never feeds a live layer.
                c, h = c_new, h_new
            if s >= L - 1:
                hs_out.append(h[:, (L - 1) * H:L * H])     # last layer, t = s-L+1

        # ----------------- Decoder epilogue: lane-dense store ----------------
        hseq = jnp.concatenate(hs_out, axis=0)             # (T*B, H), time-major
        y = (jnp.dot(hseq, decw_ref[...], preferred_element_type=f32)
             + decb_ref[...])                              # (T*B, O_pad)
        out_ref[...] = y.astype(out_ref.dtype)

    return kernel


# ----------------------------------------------------------------------------
# Wrappers (glue)
# ----------------------------------------------------------------------------
def _fused_lstm_decode(params, x_passes_bf, h0_all, c0_all):
    """x_passes_bf: (P, B, T, Din) batch-first per pass. Returns (P, B, T, O)."""
    P, B, T, Din = x_passes_bf.shape
    L, _, H = h0_all.shape
    fz = params["fused"]
    O = params["dec_w_t"].shape[-1]
    O_pad = fz["dec_w_pad"].shape[-1]

    # Layout plumbing kept in the wrapper (time-major flatten, state packing).
    x_flat = jnp.transpose(x_passes_bf, (0, 2, 1, 3)).reshape(P, T * B, Din)
    h0_comb = jnp.transpose(h0_all, (1, 0, 2)).reshape(B, L * H)
    c0_comb = jnp.transpose(c0_all, (1, 0, 2)).reshape(B, L * H)

    kernel = _make_fused_kernel(L, T, B, H, Din)
    common = [fz["wih0_t"], fz["w_big"], fz["bias_gm"], h0_comb, c0_comb,
              fz["dec_w_pad"], fz["dec_b_pad"]]

    if P == 1:
        # No grid at all: whole-array VMEM blocks, zero grid/pipeline overhead.
        y = pl.pallas_call(
            kernel,
            out_shape=jax.ShapeDtypeStruct((T * B, O_pad), jnp.float32),
        )(x_flat[0], *common)[None]
    else:
        # One grid point per independent pass, marked "parallel" so v7x can
        # place the two passes on both TensorCores (plain loop on v5e/v6e).
        def _shared(a):
            nd = a.ndim
            return pl.BlockSpec(a.shape, lambda p: (0,) * nd)

        y = pl.pallas_call(
            kernel,
            out_shape=jax.ShapeDtypeStruct((P, T * B, O_pad), jnp.float32),
            grid=(P,),
            in_specs=[pl.BlockSpec((None, T * B, Din), lambda p: (p, 0, 0))]
                     + [_shared(a) for a in common],
            out_specs=pl.BlockSpec((None, T * B, O_pad), lambda p: (p, 0, 0)),
            compiler_params=pltpu.CompilerParams(
                dimension_semantics=("parallel",)),
        )(x_flat, *common)

    y = y[:, :, :O].reshape(P, T, B, O)
    return jnp.transpose(y, (0, 2, 1, 3))                  # (P, B, T, O)


def _pack_fused(layers, dec_w_t, dec_b_row, H, L, O):
    """Pre-pack weights for the skewed block-structured fused kernel.

    Combined state layout (lanes):  [h_0 | h_1 | ... | h_{L-1}]            (L*H)
    Combined gate  layout (lanes):  [i_0..i_{L-1} | f_* | g_* | o_*]      (4*L*H)
    w_big rows l*H..(l+1)*H carry:  whh_l into layer-l gate columns (recurrent)
                                    wih_{l+1} into layer-(l+1) gate columns.
    """
    z = jnp.zeros((H, H), jnp.float32)
    rows = []
    for l in range(L):
        whh_t_l = layers[l][1]                                     # (H, 4H)
        wih_t_next = layers[l + 1][0] if l + 1 < L else None       # (H, 4H)
        cols = []
        for q in range(4):
            for lp in range(L):
                if lp == l:
                    cols.append(whh_t_l[:, q * H:(q + 1) * H])
                elif lp == l + 1:
                    cols.append(wih_t_next[:, q * H:(q + 1) * H])
                else:
                    cols.append(z)
        rows.append(jnp.concatenate(cols, axis=1))
    w_big = jnp.concatenate(rows, axis=0)                          # (L*H, 4*L*H)

    bias_cols = []
    for q in range(4):
        for lp in range(L):
            bias_cols.append(layers[lp][2][:, q * H:(q + 1) * H])
    bias_gm = jnp.concatenate(bias_cols, axis=1)                   # (1, 4*L*H)

    O_pad = ((O + 127) // 128) * 128                               # lane-dense out
    dec_w_pad = jnp.zeros((H, O_pad), jnp.float32).at[:, :O].set(dec_w_t)
    dec_b_pad = jnp.zeros((1, O_pad), jnp.float32).at[:, :O].set(dec_b_row)
    return {"wih0_t": layers[0][0], "w_big": w_big, "bias_gm": bias_gm,
            "dec_w_pad": dec_w_pad, "dec_b_pad": dec_b_pad}


def init_params(key, input_size, state_size, output_size, num_layers):
    """PyTorch-style uniform(-1/sqrt(H), 1/sqrt(H)) init, deterministic."""
    H = state_size
    bound = 1.0 / jnp.sqrt(jnp.float32(H))
    layers = []
    for l in range(num_layers):
        din = input_size if l == 0 else H
        key, k1, k2, k3, k4 = jax.random.split(key, 5)
        w_ih = jax.random.uniform(k1, (4 * H, din), jnp.float32, -bound, bound)
        w_hh = jax.random.uniform(k2, (4 * H, H), jnp.float32, -bound, bound)
        b_ih = jax.random.uniform(k3, (4 * H,), jnp.float32, -bound, bound)
        b_hh = jax.random.uniform(k4, (4 * H,), jnp.float32, -bound, bound)
        layers.append((w_ih.T, w_hh.T, (b_ih + b_hh)[None, :]))
    key, kd1, kd2 = jax.random.split(key, 3)
    dec_w = jax.random.uniform(kd1, (output_size, H), jnp.float32, -bound, bound)
    dec_b = jax.random.uniform(kd2, (output_size,), jnp.float32, -bound, bound)
    params = {"layers": layers, "dec_w_t": dec_w.T, "dec_b": dec_b[None, :]}
    params["fused"] = _pack_fused(layers, dec_w.T, dec_b[None, :], H,
                                  num_layers, output_size)
    return params


def lstmnn_forward(params, inputs, hidden_state,
                   symmetric=False, allow_negative_values=True):
    """Matches LSTMNN.forward (encoder=None branch).

    symmetric=False: the x*[-1,1] pass is dead code in the module's output, so
    it is skipped entirely.
    symmetric=True : the x and x*[-1,1] passes run as two "parallel" grid
    points of one fused kernel call (both TensorCores on v7x).
    """
    # TODO(synk): intermediate Linear encoder path (use_intermediate_encoder=True)
    # not implemented; this reproduces the default encoder=None branch.
    h0_all, c0_all = hidden_state                          # (L, B, H) each

    if symmetric:
        x_neg = inputs * jnp.array([[-1.0, 1.0]], dtype=inputs.dtype)
        x_passes = jnp.stack([inputs, x_neg], axis=0)      # (2, B, T, Din)
        y = _fused_lstm_decode(params, x_passes, h0_all, c0_all)
        output = (y[0] + jnp.flip(y[1], axis=2)) / 2.0
    else:
        y = _fused_lstm_decode(params, inputs[None], h0_all, c0_all)
        output = y[0]

    if not allow_negative_values:
        output = jax.nn.sigmoid(output)
    return output


# ----------------------------------------------------------------------------
# Pure-JAX reference (for correctness check)
# ----------------------------------------------------------------------------
def _ref_lstm_layer(seq_bf, wih_t, whh_t, b, h0, c0):
    H = h0.shape[-1]

    def step(carry, xt):
        h, c = carry
        gates = xt @ wih_t + h @ whh_t + b[0]
        i = jax.nn.sigmoid(gates[:, 0 * H:1 * H])
        f = jax.nn.sigmoid(gates[:, 1 * H:2 * H])
        g = jnp.tanh(gates[:, 2 * H:3 * H])
        o = jax.nn.sigmoid(gates[:, 3 * H:4 * H])
        c = f * c + i * g
        h = o * jnp.tanh(c)
        return (h, c), h

    xs = jnp.transpose(seq_bf, (1, 0, 2))
    _, hs = jax.lax.scan(step, (h0, c0), xs)
    return jnp.transpose(hs, (1, 0, 2))


def _ref_core(params, inputs, hidden_state):
    h0_all, c0_all = hidden_state
    h = inputs
    for l in range(h0_all.shape[0]):
        wih_t, whh_t, b = params["layers"][l]
        h = _ref_lstm_layer(h, wih_t, whh_t, b, h0_all[l], c0_all[l])
    return h @ params["dec_w_t"] + params["dec_b"][0]


def _ref_forward(params, inputs, hidden_state,
                 symmetric=False, allow_negative_values=True):
    out = _ref_core(params, inputs, hidden_state)
    if symmetric:
        x_neg = inputs * jnp.array([[-1.0, 1.0]], dtype=inputs.dtype)
        out_ = _ref_core(params, x_neg, hidden_state)
        out = (out + jnp.flip(out_, axis=2)) / 2.0
    if not allow_negative_values:
        out = jax.nn.sigmoid(out)
    return out


# ----------------------------------------------------------------------------
if __name__ == "__main__":
    input_size, state_size, output_size, num_layers = 2, 32, 2, 2
    batch, seq = 2, 8

    key = jax.random.PRNGKey(0)
    k_par, k_x = jax.random.split(key)
    params = init_params(k_par, input_size, state_size, output_size, num_layers)

    inputs = jax.random.normal(k_x, (batch, seq, input_size), jnp.float32)
    hidden_state = (jnp.zeros((num_layers, batch, state_size), jnp.float32),
                    jnp.zeros((num_layers, batch, state_size), jnp.float32))

    # Default config: symmetric=False, allow_negative_values=True.
    out = lstmnn_forward(params, inputs, hidden_state,
                         symmetric=False, allow_negative_values=True)
    out = jax.block_until_ready(out)
    ref = _ref_forward(params, inputs, hidden_state,
                       symmetric=False, allow_negative_values=True)
    assert out.shape == (batch, seq, output_size)
    assert jnp.allclose(out, ref, atol=2e-4, rtol=2e-4), "mismatch (default cfg)"

    # Symmetric path (exercises the parallel two-pass grid + flip/average).
    out_sym = lstmnn_forward(params, inputs, hidden_state,
                             symmetric=True, allow_negative_values=False)
    out_sym = jax.block_until_ready(out_sym)
    ref_sym = _ref_forward(params, inputs, hidden_state,
                           symmetric=True, allow_negative_values=False)
    assert jnp.allclose(out_sym, ref_sym, atol=2e-4, rtol=2e-4), \
        "mismatch (symmetric cfg)"

    print("KERNEL_OK")
</pallas_src>

<mosaic_0001>
module attributes {stable_mosaic.version = 11 : i64} {
  func.func @kernel(%arg0: memref<16x2xf32, #tpu.memory_space<vmem>>, %arg1: memref<2x128xf32, #tpu.memory_space<vmem>>, %arg2: memref<64x256xf32, #tpu.memory_space<vmem>>, %arg3: memref<1x256xf32, #tpu.memory_space<vmem>>, %arg4: memref<2x64xf32, #tpu.memory_space<vmem>>, %arg5: memref<2x64xf32, #tpu.memory_space<vmem>>, %arg6: memref<32x128xf32, #tpu.memory_space<vmem>>, %arg7: memref<1x128xf32, #tpu.memory_space<vmem>>, %arg8: memref<16x128xf32, #tpu.memory_space<vmem>>) attributes {dimension_semantics = [], scalar_prefetch = 0 : i64, scratch_operands = 0 : i64, tpu.core_type = #tpu.core_type<tc>} {
    %c0 = arith.constant 0 : index
    %c0_0 = arith.constant 0 : index
    %0 = vector.load %arg0[%c0, %c0_0] : memref<16x2xf32, #tpu.memory_space<vmem>>, vector<16x2xf32>
    %c0_1 = arith.constant 0 : index
    %c0_2 = arith.constant 0 : index
    %1 = vector.load %arg1[%c0_1, %c0_2] : memref<2x128xf32, #tpu.memory_space<vmem>>, vector<2x128xf32>
    %2 = vector.extract_strided_slice %0 {offsets = [0, 0], sizes = [16, 1], strides = [1, 1]} : vector<16x2xf32> to vector<16x1xf32>
    %3 = vector.extract_strided_slice %1 {offsets = [0, 0], sizes = [1, 128], strides = [1, 1]} : vector<2x128xf32> to vector<1x128xf32>
    %4 = vector.broadcast %2 : vector<16x1xf32> to vector<16x128xf32>
    %5 = vector.broadcast %3 : vector<1x128xf32> to vector<16x128xf32>
    %6 = arith.mulf %4, %5 : vector<16x128xf32>
    %7 = vector.extract_strided_slice %0 {offsets = [0, 1], sizes = [16, 1], strides = [1, 1]} : vector<16x2xf32> to vector<16x1xf32>
    %8 = vector.extract_strided_slice %1 {offsets = [1, 0], sizes = [1, 128], strides = [1, 1]} : vector<2x128xf32> to vector<1x128xf32>
    %9 = vector.broadcast %7 : vector<16x1xf32> to vector<16x128xf32>
    %10 = vector.broadcast %8 : vector<1x128xf32> to vector<16x128xf32>
    %11 = arith.mulf %9, %10 : vector<16x128xf32>
    %12 = arith.addf %6, %11 : vector<16x128xf32>
    %13 = vector.extract_strided_slice %12 {offsets = [0, 0], sizes = [16, 32], strides = [1, 1]} : vector<16x128xf32> to vector<16x32xf32>
    %cst = arith.constant 0.000000e+00 : f32
    %14 = vector.broadcast %cst : f32 to vector<16x32xf32>
    %15 = vector.extract_strided_slice %12 {offsets = [0, 32], sizes = [16, 32], strides = [1, 1]} : vector<16x128xf32> to vector<16x32xf32>
    %cst_3 = arith.constant 0.000000e+00 : f32
    %16 = vector.broadcast %cst_3 : f32 to vector<16x32xf32>
    %17 = vector.extract_strided_slice %12 {offsets = [0, 64], sizes = [16, 32], strides = [1, 1]} : vector<16x128xf32> to vector<16x32xf32>
    %cst_4 = arith.constant 0.000000e+00 : f32
    %18 = vector.broadcast %cst_4 : f32 to vector<16x32xf32>
    %19 = vector.extract_strided_slice %12 {offsets = [0, 96], sizes = [16, 32], strides = [1, 1]} : vector<16x128xf32> to vector<16x32xf32>
    %cst_5 = arith.constant 0.000000e+00 : f32
    %20 = vector.broadcast %cst_5 : f32 to vector<16x32xf32>
    %21 = tpu.concatenate %13, %14, %15, %16, %17, %18, %19, %20 in 1 : vector<16x32xf32>, vector<16x32xf32>, vector<16x32xf32>, vector<16x32xf32>, vector<16x32xf32>, vector<16x32xf32>, vector<16x32xf32>, vector<16x32xf32> -> vector<16x256xf32>
    %c0_6 = arith.constant 0 : index
    %c0_7 = arith.constant 0 : index
    %22 = vector.load %arg3[%c0_6, %c0_7] : memref<1x256xf32, #tpu.memory_space<vmem>>, vector<1x256xf32>
    %23 = vector.broadcast %22 : vector<1x256xf32> to vector<16x256xf32>
    %24 = arith.addf %21, %23 : vector<16x256xf32>
    %25 = vector.extract_strided_slice %24 {offsets = [0, 0], sizes = [2, 256], strides = [1, 1]} : vector<16x256xf32> to vector<2x256xf32>
    %26 = vector.extract_strided_slice %24 {offsets = [2, 0], sizes = [2, 256], strides = [1, 1]} : vector<16x256xf32> to vector<2x256xf32>
    %27 = vector.extract_strided_slice %24 {offsets = [4, 0], sizes = [2, 256], strides = [1, 1]} : vector<16x256xf32> to vector<2x256xf32>
    %28 = vector.extract_strided_slice %24 {offsets = [6, 0], sizes = [2, 256], strides = [1, 1]} : vector<16x256xf32> to vector<2x256xf32>
    %29 = vector.extract_strided_slice %24 {offsets = [8, 0], sizes = [2, 256], strides = [1, 1]} : vector<16x256xf32> to vector<2x256xf32>
    %30 = vector.extract_strided_slice %24 {offsets = [10, 0], sizes = [2, 256], strides = [1, 1]} : vector<16x256xf32> to vector<2x256xf32>
    %31 = vector.extract_strided_slice %24 {offsets = [12, 0], sizes = [2, 256], strides = [1, 1]} : vector<16x256xf32> to vector<2x256xf32>
    %32 = vector.extract_strided_slice %24 {offsets = [14, 0], sizes = [2, 256], strides = [1, 1]} : vector<16x256xf32> to vector<2x256xf32>
    %c0_8 = arith.constant 0 : index
    %c0_9 = arith.constant 0 : index
    %33 = vector.load %arg3[%c0_8, %c0_9] : memref<1x256xf32, #tpu.memory_space<vmem>>, vector<1x256xf32>
    %34 = vector.shape_cast %33 : vector<1x256xf32> to vector<1x256xf32>
    %35 = vector.broadcast %34 : vector<1x256xf32> to vector<2x256xf32>
    %c0_10 = arith.constant 0 : index
    %c0_11 = arith.constant 0 : index
    %36 = vector.load %arg2[%c0_10, %c0_11] : memref<64x256xf32, #tpu.memory_space<vmem>>, vector<64x256xf32>
    %c0_12 = arith.constant 0 : index
    %c0_13 = arith.constant 0 : index
    %37 = vector.load %arg4[%c0_12, %c0_13] : memref<2x64xf32, #tpu.memory_space<vmem>>, vector<2x64xf32>
    %c0_14 = arith.constant 0 : index
    %c0_15 = arith.constant 0 : index
    %38 = vector.load %arg5[%c0_14, %c0_15] : memref<2x64xf32, #tpu.memory_space<vmem>>, vector<2x64xf32>
    %39 = tpu.iota {dimensions = array<i32: 1>} : vector<1x256xi32>
    %c128_i32 = arith.constant 128 : i32
    %40 = vector.broadcast %c128_i32 : i32 to vector<1x256xi32>
    %41 = arith.cmpi sge, %39, %40 : vector<1x256xi32>
    %c192_i32 = arith.constant 192 : i32
    %42 = vector.broadcast %c192_i32 : i32 to vector<1x256xi32>
    %43 = arith.cmpi slt, %39, %42 : vector<1x256xi32>
    %44 = arith.andi %41, %43 : vector<1x256xi1>
    %cst_16 = arith.constant 1.000000e+00 : f32
    %cst_17 = arith.constant 5.000000e-01 : f32
    %45 = vector.broadcast %cst_16 : f32 to vector<1x256xf32>
    %46 = vector.broadcast %cst_17 : f32 to vector<1x256xf32>
    %47 = arith.select %44, %45, %46 : vector<1x256xi1>, vector<1x256xf32>
    %48 = vector.shape_cast %47 : vector<1x256xf32> to vector<1x256xf32>
    %49 = vector.broadcast %48 : vector<1x256xf32> to vector<2x256xf32>
    %cst_18 = arith.constant 0.000000e+00 : f32
    %cst_19 = arith.constant 5.000000e-01 : f32
    %50 = vector.broadcast %cst_18 : f32 to vector<1x256xf32>
    %51 = vector.broadcast %cst_19 : f32 to vector<1x256xf32>
    %52 = arith.select %44, %50, %51 : vector<1x256xi1>, vector<1x256xf32>
    %53 = vector.shape_cast %52 : vector<1x256xf32> to vector<1x256xf32>
    %54 = vector.broadcast %53 : vector<1x256xf32> to vector<2x256xf32>
    %55 = tpu.iota {dimensions = array<i32: 1>} : vector<2x64xi32>
    %cst_20 = arith.constant dense<0.000000e+00> : vector<2x256xf32>
    %56 = tpu.matmul %37, %36, %cst_20 {dimension_numbers = #tpu.dot_dimension_numbers<[1], [0], [0], [1], [0, 0, 1, 1], [], []>} : vector<2x64xf32>, vector<64x256xf32>, vector<2x256xf32> -> vector<2x256xf32>
    %57 = arith.addf %56, %25 : vector<2x256xf32>
    %58 = arith.mulf %57, %49 : vector<2x256xf32>
    %59 = math.tanh %58 : vector<2x256xf32>
    %60 = arith.mulf %59, %49 : vector<2x256xf32>
    %61 = arith.addf %60, %54 : vector<2x256xf32>
    %62 = vector.extract_strided_slice %61 {offsets = [0, 0], sizes = [2, 64], strides = [1, 1]} : vector<2x256xf32> to vector<2x64xf32>
    %63 = vector.extract_strided_slice %61 {offsets = [0, 64], sizes = [2, 64], strides = [1, 1]} : vector<2x256xf32> to vector<2x64xf32>
    %64 = vector.extract_strided_slice %61 {offsets = [0, 128], sizes = [2, 64], strides = [1, 1]} : vector<2x256xf32> to vector<2x64xf32>
    %65 = vector.extract_strided_slice %61 {offsets = [0, 192], sizes = [2, 64], strides = [1, 1]} : vector<2x256xf32> to vector<2x64xf32>
    %66 = arith.mulf %63, %38 : vector<2x64xf32>
    %67 = arith.mulf %62, %64 : vector<2x64xf32>
    %68 = arith.addf %66, %67 : vector<2x64xf32>
    %69 = math.tanh %68 : vector<2x64xf32>
    %70 = arith.mulf %65, %69 : vector<2x64xf32>
    %c32_i32 = arith.constant 32 : i32
    %71 = vector.broadcast %c32_i32 : i32 to vector<2x64xi32>
    %72 = arith.cmpi slt, %55, %71 : vector<2x64xi32>
    %73 = arith.select %72, %68, %38 : vector<2x64xi1>, vector<2x64xf32>
    %74 = arith.select %72, %70, %37 : vector<2x64xi1>, vector<2x64xf32>
    %cst_21 = arith.constant dense<0.000000e+00> : vector<2x256xf32>
    %75 = tpu.matmul %74, %36, %cst_21 {dimension_numbers = #tpu.dot_dimension_numbers<[1], [0], [0], [1], [0, 0, 1, 1], [], []>} : vector<2x64xf32>, vector<64x256xf32>, vector<2x256xf32> -> vector<2x256xf32>
    %76 = arith.addf %75, %26 : vector<2x256xf32>
    %77 = arith.mulf %76, %49 : vector<2x256xf32>
    %78 = math.tanh %77 : vector<2x256xf32>
    %79 = arith.mulf %78, %49 : vector<2x256xf32>
    %80 = arith.addf %79, %54 : vector<2x256xf32>
    %81 = vector.extract_strided_slice %80 {offsets = [0, 0], sizes = [2, 64], strides = [1, 1]} : vector<2x256xf32> to vector<2x64xf32>
    %82 = vector.extract_strided_slice %80 {offsets = [0, 64], sizes = [2, 64], strides = [1, 1]} : vector<2x256xf32> to vector<2x64xf32>
    %83 = vector.extract_strided_slice %80 {offsets = [0, 128], sizes = [2, 64], strides = [1, 1]} : vector<2x256xf32> to vector<2x64xf32>
    %84 = vector.extract_strided_slice %80 {offsets = [0, 192], sizes = [2, 64], strides = [1, 1]} : vector<2x256xf32> to vector<2x64xf32>
    %85 = arith.mulf %82, %73 : vector<2x64xf32>
    %86 = arith.mulf %81, %83 : vector<2x64xf32>
    %87 = arith.addf %85, %86 : vector<2x64xf32>
    %88 = math.tanh %87 : vector<2x64xf32>
    %89 = arith.mulf %84, %88 : vector<2x64xf32>
    %90 = vector.extract_strided_slice %89 {offsets = [0, 32], sizes = [2, 32], strides = [1, 1]} : vector<2x64xf32> to vector<2x32xf32>
    %cst_22 = arith.constant dense<0.000000e+00> : vector<2x256xf32>
    %91 = tpu.matmul %89, %36, %cst_22 {dimension_numbers = #tpu.dot_dimension_numbers<[1], [0], [0], [1], [0, 0, 1, 1], [], []>} : vector<2x64xf32>, vector<64x256xf32>, vector<2x256xf32> -> vector<2x256xf32>
    %92 = arith.addf %91, %27 : vector<2x256xf32>
    %93 = arith.mulf %92, %49 : vector<2x256xf32>
    %94 = math.tanh %93 : vector<2x256xf32>
    %95 = arith.mulf %94, %49 : vector<2x256xf32>
    %96 = arith.addf %95, %54 : vector<2x256xf32>
    %97 = vector.extract_strided_slice %96 {offsets = [0, 0], sizes = [2, 64], strides = [1, 1]} : vector<2x256xf32> to vector<2x64xf32>
    %98 = vector.extract_strided_slice %96 {offsets = [0, 64], sizes = [2, 64], strides = [1, 1]} : vector<2x256xf32> to vector<2x64xf32>
    %99 = vector.extract_strided_slice %96 {offsets = [0, 128], sizes = [2, 64], strides = [1, 1]} : vector<2x256xf32> to vector<2x64xf32>
    %100 = vector.extract_strided_slice %96 {offsets = [0, 192], sizes = [2, 64], strides = [1, 1]} : vector<2x256xf32> to vector<2x64xf32>
    %101 = arith.mulf %98, %87 : vector<2x64xf32>
    %102 = arith.mulf %97, %99 : vector<2x64xf32>
    %103 = arith.addf %101, %102 : vector<2x64xf32>
    %104 = math.tanh %103 : vector<2x64xf32>
    %105 = arith.mulf %100, %104 : vector<2x64xf32>
    %106 = vector.extract_strided_slice %105 {offsets = [0, 32], sizes = [2, 32], strides = [1, 1]} : vector<2x64xf32> to vector<2x32xf32>
    %cst_23 = arith.constant dense<0.000000e+00> : vector<2x256xf32>
    %107 = tpu.matmul %105, %36, %cst_23 {dimension_numbers = #tpu.dot_dimension_numbers<[1], [0], [0], [1], [0, 0, 1, 1], [], []>} : vector<2x64xf32>, vector<64x256xf32>, vector<2x256xf32> -> vector<2x256xf32>
    %108 = arith.addf %107, %28 : vector<2x256xf32>
    %109 = arith.mulf %108, %49 : vector<2x256xf32>
    %110 = math.tanh %109 : vector<2x256xf32>
    %111 = arith.mulf %110, %49 : vector<2x256xf32>
    %112 = arith.addf %111, %54 : vector<2x256xf32>
    %113 = vector.extract_strided_slice %112 {offsets = [0, 0], sizes = [2, 64], strides = [1, 1]} : vector<2x256xf32> to vector<2x64xf32>
    %114 = vector.extract_strided_slice %112 {offsets = [0, 64], sizes = [2, 64], strides = [1, 1]} : vector<2x256xf32> to vector<2x64xf32>
    %115 = vector.extract_strided_slice %112 {offsets = [0, 128], sizes = [2, 64], strides = [1, 1]} : vector<2x256xf32> to vector<2x64xf32>
    %116 = vector.extract_strided_slice %112 {offsets = [0, 192], sizes = [2, 64], strides = [1, 1]} : vector<2x256xf32> to vector<2x64xf32>
    %117 = arith.mulf %114, %103 : vector<2x64xf32>
    %118 = arith.mulf %113, %115 : vector<2x64xf32>
    %119 = arith.addf %117, %118 : vector<2x64xf32>
    %120 = math.tanh %119 : vector<2x64xf32>
    %121 = arith.mulf %116, %120 : vector<2x64xf32>
    %122 = vector.extract_strided_slice %121 {offsets = [0, 32], sizes = [2, 32], strides = [1, 1]} : vector<2x64xf32> to vector<2x32xf32>
    %cst_24 = arith.constant dense<0.000000e+00> : vector<2x256xf32>
    %123 = tpu.matmul %121, %36, %cst_24 {dimension_numbers = #tpu.dot_dimension_numbers<[1], [0], [0], [1], [0, 0, 1, 1], [], []>} : vector<2x64xf32>, vector<64x256xf32>, vector<2x256xf32> -> vector<2x256xf32>
    %124 = arith.addf %123, %29 : vector<2x256xf32>
    %125 = arith.mulf %124, %49 : vector<2x256xf32>
    %126 = math.tanh %125 : vector<2x256xf32>
    %127 = arith.mulf %126, %49 : vector<2x256xf32>
    %128 = arith.addf %127, %54 : vector<2x256xf32>
    %129 = vector.extract_strided_slice %128 {offsets = [0, 0], sizes = [2, 64], strides = [1, 1]} : vector<2x256xf32> to vector<2x64xf32>
    %130 = vector.extract_strided_slice %128 {offsets = [0, 64], sizes = [2, 64], strides = [1, 1]} : vector<2x256xf32> to vector<2x64xf32>
    %131 = vector.extract_strided_slice %128 {offsets = [0, 128], sizes = [2, 64], strides = [1, 1]} : vector<2x256xf32> to vector<2x64xf32>
    %132 = vector.extract_strided_slice %128 {offsets = [0, 192], sizes = [2, 64], strides = [1, 1]} : vector<2x256xf32> to vector<2x64xf32>
    %133 = arith.mulf %130, %119 : vector<2x64xf32>
    %134 = arith.mulf %129, %131 : vector<2x64xf32>
    %135 = arith.addf %133, %134 : vector<2x64xf32>
    %136 = math.tanh %135 : vector<2x64xf32>
    %137 = arith.mulf %132, %136 : vector<2x64xf32>
    %138 = vector.extract_strided_slice %137 {offsets = [0, 32], sizes = [2, 32], strides = [1, 1]} : vector<2x64xf32> to vector<2x32xf32>
    %cst_25 = arith.constant dense<0.000000e+00> : vector<2x256xf32>
    %139 = tpu.matmul %137, %36, %cst_25 {dimension_numbers = #tpu.dot_dimension_numbers<[1], [0], [0], [1], [0, 0, 1, 1], [], []>} : vector<2x64xf32>, vector<64x256xf32>, vector<2x256xf32> -> vector<2x256xf32>
    %140 = arith.addf %139, %30 : vector<2x256xf32>
    %141 = arith.mulf %140, %49 : vector<2x256xf32>
    %142 = math.tanh %141 : vector<2x256xf32>
    %143 = arith.mulf %142, %49 : vector<2x256xf32>
    %144 = arith.addf %143, %54 : vector<2x256xf32>
    %145 = vector.extract_strided_slice %144 {offsets = [0, 0], sizes = [2, 64], strides = [1, 1]} : vector<2x256xf32> to vector<2x64xf32>
    %146 = vector.extract_strided_slice %144 {offsets = [0, 64], sizes = [2, 64], strides = [1, 1]} : vector<2x256xf32> to vector<2x64xf32>
    %147 = vector.extract_strided_slice %144 {offsets = [0, 128], sizes = [2, 64], strides = [1, 1]} : vector<2x256xf32> to vector<2x64xf32>
    %148 = vector.extract_strided_slice %144 {offsets = [0, 192], sizes = [2, 64], strides = [1, 1]} : vector<2x256xf32> to vector<2x64xf32>
    %149 = arith.mulf %146, %135 : vector<2x64xf32>
    %150 = arith.mulf %145, %147 : vector<2x64xf32>
    %151 = arith.addf %149, %150 : vector<2x64xf32>
    %152 = math.tanh %151 : vector<2x64xf32>
    %153 = arith.mulf %148, %152 : vector<2x64xf32>
    %154 = vector.extract_strided_slice %153 {offsets = [0, 32], sizes = [2, 32], strides = [1, 1]} : vector<2x64xf32> to vector<2x32xf32>
    %cst_26 = arith.constant dense<0.000000e+00> : vector<2x256xf32>
    %155 = tpu.matmul %153, %36, %cst_26 {dimension_numbers = #tpu.dot_dimension_numbers<[1], [0], [0], [1], [0, 0, 1, 1], [], []>} : vector<2x64xf32>, vector<64x256xf32>, vector<2x256xf32> -> vector<2x256xf32>
    %156 = arith.addf %155, %31 : vector<2x256xf32>
    %157 = arith.mulf %156, %49 : vector<2x256xf32>
    %158 = math.tanh %157 : vector<2x256xf32>
    %159 = arith.mulf %158, %49 : vector<2x256xf32>
    %160 = arith.addf %159, %54 : vector<2x256xf32>
    %161 = vector.extract_strided_slice %160 {offsets = [0, 0], sizes = [2, 64], strides = [1, 1]} : vector<2x256xf32> to vector<2x64xf32>
    %162 = vector.extract_strided_slice %160 {offsets = [0, 64], sizes = [2, 64], strides = [1, 1]} : vector<2x256xf32> to vector<2x64xf32>
    %163 = vector.extract_strided_slice %160 {offsets = [0, 128], sizes = [2, 64], strides = [1, 1]} : vector<2x256xf32> to vector<2x64xf32>
    %164 = vector.extract_strided_slice %160 {offsets = [0, 192], sizes = [2, 64], strides = [1, 1]} : vector<2x256xf32> to vector<2x64xf32>
    %165 = arith.mulf %162, %151 : vector<2x64xf32>
    %166 = arith.mulf %161, %163 : vector<2x64xf32>
    %167 = arith.addf %165, %166 : vector<2x64xf32>
    %168 = math.tanh %167 : vector<2x64xf32>
    %169 = arith.mulf %164, %168 : vector<2x64xf32>
    %170 = vector.extract_strided_slice %169 {offsets = [0, 32], sizes = [2, 32], strides = [1, 1]} : vector<2x64xf32> to vector<2x32xf32>
    %cst_27 = arith.constant dense<0.000000e+00> : vector<2x256xf32>
    %171 = tpu.matmul %169, %36, %cst_27 {dimension_numbers = #tpu.dot_dimension_numbers<[1], [0], [0], [1], [0, 0, 1, 1], [], []>} : vector<2x64xf32>, vector<64x256xf32>, vector<2x256xf32> -> vector<2x256xf32>
    %172 = arith.addf %171, %32 : vector<2x256xf32>
    %173 = arith.mulf %172, %49 : vector<2x256xf32>
    %174 = math.tanh %173 : vector<2x256xf32>
    %175 = arith.mulf %174, %49 : vector<2x256xf32>
    %176 = arith.addf %175, %54 : vector<2x256xf32>
    %177 = vector.extract_strided_slice %176 {offsets = [0, 0], sizes = [2, 64], strides = [1, 1]} : vector<2x256xf32> to vector<2x64xf32>
    %178 = vector.extract_strided_slice %176 {offsets = [0, 64], sizes = [2, 64], strides = [1, 1]} : vector<2x256xf32> to vector<2x64xf32>
    %179 = vector.extract_strided_slice %176 {offsets = [0, 128], sizes = [2, 64], strides = [1, 1]} : vector<2x256xf32> to vector<2x64xf32>
    %180 = vector.extract_strided_slice %176 {offsets = [0, 192], sizes = [2, 64], strides = [1, 1]} : vector<2x256xf32> to vector<2x64xf32>
    %181 = arith.mulf %178, %167 : vector<2x64xf32>
    %182 = arith.mulf %177, %179 : vector<2x64xf32>
    %183 = arith.addf %181, %182 : vector<2x64xf32>
    %184 = math.tanh %183 : vector<2x64xf32>
    %185 = arith.mulf %180, %184 : vector<2x64xf32>
    %186 = vector.extract_strided_slice %185 {offsets = [0, 32], sizes = [2, 32], strides = [1, 1]} : vector<2x64xf32> to vector<2x32xf32>
    %cst_28 = arith.constant dense<0.000000e+00> : vector<2x256xf32>
    %187 = tpu.matmul %185, %36, %cst_28 {dimension_numbers = #tpu.dot_dimension_numbers<[1], [0], [0], [1], [0, 0, 1, 1], [], []>} : vector<2x64xf32>, vector<64x256xf32>, vector<2x256xf32> -> vector<2x256xf32>
    %188 = arith.addf %187, %35 : vector<2x256xf32>
    %189 = arith.mulf %188, %49 : vector<2x256xf32>
    %190 = math.tanh %189 : vector<2x256xf32>
    %191 = arith.mulf %190, %49 : vector<2x256xf32>
    %192 = arith.addf %191, %54 : vector<2x256xf32>
    %193 = vector.extract_strided_slice %192 {offsets = [0, 0], sizes = [2, 64], strides = [1, 1]} : vector<2x256xf32> to vector<2x64xf32>
    %194 = vector.extract_strided_slice %192 {offsets = [0, 64], sizes = [2, 64], strides = [1, 1]} : vector<2x256xf32> to vector<2x64xf32>
    %195 = vector.extract_strided_slice %192 {offsets = [0, 128], sizes = [2, 64], strides = [1, 1]} : vector<2x256xf32> to vector<2x64xf32>
    %196 = vector.extract_strided_slice %192 {offsets = [0, 192], sizes = [2, 64], strides = [1, 1]} : vector<2x256xf32> to vector<2x64xf32>
    %197 = arith.mulf %194, %183 : vector<2x64xf32>
    %198 = arith.mulf %193, %195 : vector<2x64xf32>
    %199 = arith.addf %197, %198 : vector<2x64xf32>
    %200 = math.tanh %199 : vector<2x64xf32>
    %201 = arith.mulf %196, %200 : vector<2x64xf32>
    %202 = vector.extract_strided_slice %201 {offsets = [0, 32], sizes = [2, 32], strides = [1, 1]} : vector<2x64xf32> to vector<2x32xf32>
    %203 = tpu.concatenate %90, %106, %122, %138, %154, %170, %186, %202 in 0 : vector<2x32xf32>, vector<2x32xf32>, vector<2x32xf32>, vector<2x32xf32>, vector<2x32xf32>, vector<2x32xf32>, vector<2x32xf32>, vector<2x32xf32> -> vector<16x32xf32>
    %c0_29 = arith.constant 0 : index
    %c0_30 = arith.constant 0 : index
    %204 = vector.load %arg6[%c0_29, %c0_30] : memref<32x128xf32, #tpu.memory_space<vmem>>, vector<32x128xf32>
    %cst_31 = arith.constant dense<0.000000e+00> : vector<16x128xf32>
    %205 = tpu.matmul %203, %204, %cst_31 {dimension_numbers = #tpu.dot_dimension_numbers<[1], [0], [0], [1], [0, 0, 1, 1], [], []>} : vector<16x32xf32>, vector<32x128xf32>, vector<16x128xf32> -> vector<16x128xf32>
    %c0_32 = arith.constant 0 : index
    %c0_33 = arith.constant 0 : index
    %206 = vector.load %arg7[%c0_32, %c0_33] : memref<1x128xf32, #tpu.memory_space<vmem>>, vector<1x128xf32>
    %207 = vector.broadcast %206 : vector<1x128xf32> to vector<16x128xf32>
    %208 = arith.addf %205, %207 : vector<16x128xf32>
    %c0_34 = arith.constant 0 : index
    %c0_35 = arith.constant 0 : index
    %209 = vector.load %arg8[%c0_34, %c0_35] : memref<16x128xf32, #tpu.memory_space<vmem>>, vector<16x128xf32>
    tpu.vector_store %arg8[%c0_34, %c0_35], %208 {strides = array<i32>} : memref<16x128xf32, #tpu.memory_space<vmem>>, vector<16x128xf32>,
    return
  }
}

</mosaic_0001>

<bundles_post_ra>
// kernel: tpu_custom_call.1
= control target key start
LH: loop header
LB: loop body
LE: loop exit
PB: predicated region body
PF: predicated region fallthrough
CT: control target
= control target key end

     0   :  { %13 = vsyncpa [#allocation3], 0  ;;  %s1838_s0 = inlined_call_operand.vmem [shape: f32[16,2], index: 0, kind: input, shape index: {}]   ;;  %s1839_s1 = inlined_call_operand.vmem [shape: f32[2,128], index: 1, kind: input, shape index: {}]   ;;  %s1840_s2 = inlined_call_operand.hbm [shape: f32[64,256], index: 2, kind: input, shape index: {}]   ;;  %s1841_s3 = inlined_call_operand.vmem [shape: f32[1,256], index: 3, kind: input, shape index: {}]   ;;  %s1842_s4 = inlined_call_operand.vmem [shape: f32[2,64], index: 4, kind: input, shape index: {}]   ;;  %s1843_s5 = inlined_call_operand.vmem [shape: f32[2,64], index: 5, kind: input, shape index: {}]   ;;  %s1844_s6 = inlined_call_operand.vmem [shape: f32[32,128], index: 6, kind: input, shape index: {}]   ;;  %s1845_s7 = inlined_call_operand.vmem [shape: f32[1,128], index: 7, kind: input, shape index: {}]   ;;  %s1846_s8 = inlined_call_operand.hbm [shape: f32[16,128], index: 8, kind: output, shape index: {}]  }
   0x1   :  { %14 = vsyncpa [#allocation4], 0  ;;  %s1477_s27 = smov [#allocation2]   ;;  %s1429_s9 = scalar_lea.hbm %s1840_s2, 2048 }
   0x2   :  { %s24_s28 = sshll.u32 %s1477_s27, 4  ;;  %p1430_p0 = scmp.ne.s32.totalorder %s1840_s2, %s1429_s9  ;;  %s25_s28 = int_to_ptr.vmem [resolvable:$true] %s24_s28 }
   0x3   :  { %p1433_p1 = scmp.lt.u32.totalorder %s1429_s9, %s1840_s2 }
   0x5   :  { %p1435_p2 = pnand %p1433_p1, %p1430_p0 }
   0x7   :  { %1438 = shalt.err (!%p1435_p2)
}
   0x8   :  { %s1439_s14 = scalar_lea.vmem %s25_s28, 2048  ;;  %p1444_p4 = scmp.lt.s32.totalorder %s25_s28, %s25_s28 }
   0x9   :  { %p1440_p3 = scmp.ne.s32.totalorder %s25_s28, %s1439_s14  ;;  %p1445_p5 = scmp.lt.s32.totalorder %s1439_s14, %s1439_s14 }
   0xb   :  { %p1446_p6 = por %p1445_p5, %p1444_p4 }
   0xd   :  { %p1447_p7 = pnand %p1446_p6, %p1440_p3 }
   0xf   :  { %1450 = shalt.err (!%p1447_p7)
}
  0x10   :  { %s1478_s15 = smov 256   ;;  %s1479_s16 = smov 16  }
  0x11   :  { %30 = dma.hbm_to_vmem [thread:$0]  %s1840_s2, 2048, %s25_s28, [#allocation3], %s1478_s15, %s1478_s15, %s1479_s16  }
  0x12   :  { %1473 = dma.done.wait [#allocation3], 2048  }
  0x13   :  { %1474 = vsyncadd [#allocation3], 4294965248  ;;  %v1480_v0 = vmov 0   ;;  %v1481_v1 = vmov 0.0   ;;  %v44_v2 = vld [vmem:[%s1838_s0] sm:$0xff]  ;;  %v131_v3 = vld [vmem:[#allocation2 + $0x8] sm:$0xff]  ;;  %v57_v30 = vlaneseq }
  0x14   :  { %1372 = vset.pattern.permute.xlu0 %v1480_v0  ;;  %228 = vmatprep.mubr.f32.mxu0 %v1481_v1  ;;  %v133_v4 = vld [vmem:[#allocation2 + $0x18] sm:$0xff]  ;;  %v130_v6 = vld [vmem:[#allocation2] sm:$0xff]  ;;  %v132_v7 = vld [vmem:[#allocation2 + $0x10] sm:$0xff]  ;;  %v1482_v17 = vmov 1   ;;  %vm102_vm0 = vcmask 523264   ;;  %s1483_s24 = smov 64  }
  0x15   :  { %340 = vmatprep.mubr.f32.mxu1 %v1481_v1  ;;  %1374 = vset.pattern.permute.xlu1 %v1480_v0  ;;  %v1552_v5 = vpack.c.bf16 %v133_v4, %v131_v3  ;;  %v135_v8 = vld [vmem:[#allocation2 + $0x28] sm:$0xff]  ;;  %v1554_v9 = vpack.c.bf16 %v132_v7, %v130_v6  ;;  %v137_v10 = vld [vmem:[#allocation2 + $0x38] sm:$0xff]  ;;  %v134_v11 = vld [vmem:[#allocation2 + $0x20] sm:$0xff]  ;;  %v58_v31 = vshrl.u32 %v57_v30, 7  ;;  %s1484_s25 = smov 32   ;;  %s1485_s26 = smov 96  }
  0x16   :  { %49 = vperm.xlu0 %1372, %v44_v2   ;;  %v136_v12 = vld [vmem:[#allocation2 + $0x30] sm:$0xff]  ;;  %v1557_v13 = vpack.c.bf16 %v137_v10, %v135_v8  ;;  %v139_v14 = vld [vmem:[#allocation2 + $0x48] sm:$0xff]  ;;  %v141_v15 = vld [vmem:[#allocation2 + $0x58] sm:$0xff]  ;;  %v149_v46 = vand.u32 127, %v57_v30  ;;  %vm99_vm1 = vcmask 261120   ;;  %vm105_vm2 = vcmask 785408  }
  0x17   :  { %1208 = vmatprep.subr.bf16.mxu0 %v1552_v5  ;;  %1224 = vmatprep.subr.bf16.mxu1 %v1552_v5  ;;  %v1561_v16 = vpack.c.bf16 %v136_v12, %v134_v11  ;;  %v1565_v18 = vpack.c.bf16 %v141_v15, %v139_v14  ;;  %v138_v19 = vld [vmem:[#allocation2 + $0x40] sm:$0xff]  ;;  %v140_v20 = vld [vmem:[#allocation2 + $0x50] sm:$0xff]  ;;  %v143_v21 = vld [vmem:[#allocation2 + $0x68] sm:$0xff]  ;;  %v59_v32 = vsub.s32 0, %v58_v31  ;;  %v73_v33 = vsub.s32 1, %v58_v31  ;;  %s1487_s15 = smov [#allocation5]  }
  0x18   :  { %1210 = vmatpush1.bf16.msra.mxu0 %v1554_v9  ;;  %1226 = vmatpush1.bf16.msra.mxu1 %v1554_v9  ;;  %v145_v22 = vld [vmem:[#allocation2 + $0x78] sm:$0xff]  ;;  %v1569_v23 = vpack.c.bf16 %v140_v20, %v138_v19  ;;  %v142_v25 = vld [vmem:[#allocation2 + $0x60] sm:$0xff]  ;;  %v144_v26 = vld [vmem:[#allocation2 + $0x70] sm:$0xff]  ;;  %v150_v50 = vadd.s32 128, %v149_v46  ;;  %v1486_v62 = vmov 0.5   ;;  %vm256_vm4 = vcmp.lt.s32.totalorder %v149_v46, 32 }
  0x19   :  { %1212 = vmatprep.subr.bf16.mxu0 %v1557_v13  ;;  %1228 = vmatprep.subr.bf16.mxu1 %v1557_v13  ;;  %v1573_v24 = vpack.c.bf16 %v145_v22, %v143_v21  ;;  %v1577_v27 = vpack.c.bf16 %v144_v26, %v142_v25  ;;  %v1586_v28 = vld [vmem:[%s1842_s4] sm:$0x3]  ;;  %vm1054_vm5 = vcmask 1041408   ;;  %vm1056_vm6 = vcmask 1043456   ;;  %s1166_s16 = sshll.u32 %s1487_s15, 4  ;;  %s1167_s16 = int_to_ptr.vmem [resolvable:$true] %s1166_s16 }
  0x1a   :  { %1373 = vset.pattern.permute.xlu0 %v1482_v17  ;;  %v1594_v29 = vld [vmem:[%s1843_s5] sm:$0x3]  ;;  %vm154_vm3 = vcmp.lt.s32.totalorder %v150_v50, 192  ;;  %vm1058_vm7 = vcmask 1045504   ;;  %s1451_s17 = scalar_lea.vmem %s1167_s16, 256  ;;  %p1456_p9 = scmp.lt.s32.totalorder %s1167_s16, %s1167_s16 }
  0x1b   :  { %64 = vperm.xlu0 %1373, %v44_v2   ;;  %v46_v34 = vld [vmem:[%s1839_s1] sm:$0x3]  ;;  %v1641_v63 = vsel %vm154_vm3, 1.0, %v1486_v62  ;;  %v1645_v7 = vsel %vm154_vm3, 0.0, %v1486_v62  ;;  %p1452_p8 = scmp.ne.s32.totalorder %s1167_s16, %s1451_s17  ;;  %p1457_p10 = scmp.lt.s32.totalorder %s1451_s17, %s1451_s17 }
  0x1c   :  { %1214 = vmatpush1.bf16.msra.mxu0 %v1561_v16  ;;  %1230 = vmatpush1.bf16.msra.mxu1 %v1561_v16  ;;  %v1612_v36 = vrot.slane %v46_v34, %v59_v32  ;;  %v1614_v37 = vrot.slane %v46_v34, %v73_v33  ;;  %v114_v44 = vld [vmem:[%s1841_s3] sm:$0x3] }
  0x1d   :  { %1216 = vmatprep.subr.bf16.mxu0 %v1565_v18  ;;  %1232 = vmatprep.subr.bf16.mxu1 %v1565_v18  ;;  %v1624_v47 = vrot.slane %v114_v44, %v59_v32  ;;  %v1629_v53 = vrot.slane %v114_v44, %v73_v33  ;;  %p1458_p11 = por %p1457_p10, %p1456_p9 }
  0x1f   :  { %244 = vrot.lane.b32.xlu0 %v1594_v29, %s1483_s24  ;;  %p1459_p12 = pnand %p1458_p11, %p1452_p8 }
  0x20   :  { %1218 = vmatpush1.bf16.msra.mxu0 %v1569_v23  ;;  %1234 = vmatpush1.bf16.msra.mxu1 %v1569_v23 }
  0x21   :  { %1220 = vmatprep.subr.bf16.mxu0 %v1573_v24  ;;  %1236 = vmatprep.subr.bf16.mxu1 %v1573_v24 }
  0x24   :  { %1222 = vmatpush1.bf16.msra.mxu0 %v1577_v27  ;;  %1238 = vmatpush1.bf16.msra.mxu1 %v1577_v27 }
  0x25   :  { %1240 = vmatprep.subr.bf16.mxu0 %v1552_v5  ;;  %1256 = vmatprep.subr.bf16.mxu1 %v1552_v5 }
  0x27   :  { %1178 = vmatmul.mubr.msk.f32.vlgmr.msra.gmra.mrb[0].mxu0 %vm102_vm0, %v1586_v28 }
  0x28   :  { %1242 = vmatpush1.bf16.msra.mxu0 %v1554_v9  ;;  %441 = vmatprep.mubr.f32.mxu0 %v1481_v1 }
  0x29   :  { %1244 = vmatprep.subr.bf16.mxu0 %v1557_v13 }
  0x2c   :  { %1246 = vmatpush1.bf16.msra.mxu0 %v1561_v16 }
  0x2d   :  { %1248 = vmatprep.subr.bf16.mxu0 %v1565_v18 }
  0x30   :  { %1250 = vmatpush1.bf16.msra.mxu0 %v1569_v23 }
  0x31   :  { %1252 = vmatprep.subr.bf16.mxu0 %v1573_v24 }
  0x34   :  { %1254 = vmatpush1.bf16.msra.mxu0 %v1577_v27 }
  0x35   :  { %1272 = vmatprep.subr.bf16.mxu0 %v1552_v5 }
  0x95   :  { %v50_v35 = vpop.permute.xlu0 %49 }
  0x96   :  { %v61_v39 = vmul.f32 %v1612_v36, %v50_v35 }
  0x9a   :  { %v65_v38 = vpop.permute.xlu0 %64 }
  0x9b   :  { %v75_v40 = vmul.f32 %v1614_v37, %v65_v38 }
  0x9d   :  { %v77_v41 = vadd.f32 %v75_v40, %v61_v39 }
  0x9e   :  { %v245_v14 = vpop.permute.xlu0 %244 }
  0x9f   :  { %87 = vrot.lane.b32.xlu1 %v77_v41, %s1483_s24  ;;  %v100_v49 = vsel %vm99_vm1, %v77_v41, 0.0 }
  0xa3   :  { %81 = vrot.lane.b32.xlu1 %v77_v41, %s1484_s25 }
  0xa7   :  { %93 = vrot.lane.b32.xlu1 %v77_v41, %s1485_s26 }
  0xfa   :  { %v230_v42 = vpop.f32.mrb[0].mxu0 }
  0xfb   :  { %v232_v43 = vpop.f32.mrb[1].mxu0 }
 0x111   :  { %v88_v45 = vpop.permute.xlu1 %87 }
 0x112   :  { %v108_v55 = vsel %vm99_vm1, %v88_v45, 0.0 }
 0x115   :  { %v82_v48 = vpop.permute.xlu1 %81 }
 0x116   :  { %v103_v51 = vsel %vm102_vm0, %v100_v49, %v82_v48 }
 0x117   :  { %v106_v52 = vsel %vm105_vm2, %v103_v51, 0.0 }
 0x118   :  { %v1632_v54 = vadd.f32 %v1624_v47, %v106_v52 }
 0x119   :  { %v94_v56 = vpop.permute.xlu1 %93 }
 0x11a   :  { %v231_v57 = vadd.f32 %v230_v42, %v1632_v54  ;;  %v110_v58 = vsel %vm102_vm0, %v108_v55, %v94_v56  ;;  %v371_v56 = vrot.slane %v1632_v54, 4 }
 0x11b   :  { %v112_v59 = vsel %vm105_vm2, %v110_v58, 0.0 }
 0x11c   :  { %v235_v60 = vmul.f32 0.5, %v231_v57  ;;  %v1639_v61 = vadd.f32 %v1629_v53, %v112_v59 }
 0x11e   :  { %1375 = vtanh.f32 %v235_v60  ;;  %v233_v0 = vadd.f32 %v232_v43, %v1639_v61  ;;  %v270_v31 = vrot.slane %v1639_v61, 2  ;;  %v372_v58 = vrot.slane %v1639_v61, 4 }
 0x120   :  { %v236_v2 = vmul.f32 %v233_v0, %v1641_v63 }
 0x122   :  { %1377 = vtanh.f32 %v236_v2 }
 0x128   :  { %v1376_v3 = vpop.eup %1375 }
 0x129   :  { %v239_v4 = vmul.f32 0.5, %v1376_v3 }
 0x12b   :  { %v241_v10 = vadd.f32 0.5, %v239_v4 }
 0x12c   :  { %v1378_v6 = vpop.eup %1377 }
 0x12d   :  { %v240_v8 = vmul.f32 %v1378_v6, %v1641_v63  ;;  %v247_v15 = vmul.f32 %v245_v14, %v241_v10 }
 0x12f   :  { %v242_v11 = vadd.f32 %v240_v8, %v1645_v7 }
 0x131   :  { %v248_v12 = vmul.f32 %v242_v11, %v241_v10 }
 0x133   :  { %250 = vrot.lane.b32.xlu1 %v248_v12, %s1483_s24 }
 0x1a5   :  { %v251_v17 = vpop.permute.xlu1 %250 }
 0x1a6   :  { %v253_v19 = vadd.f32 %v251_v17, %v247_v15 }
 0x1a8   :  { %1379 = vtanh.f32 %v253_v19  ;;  %258 = vrot.lane.b32.xlu1 %v253_v19, %s1483_s24 }
 0x1b2   :  { %v1380_v20 = vpop.eup %1379 }
 0x1b3   :  { %v255_v21 = vmul.f32 %v1380_v20, %v242_v11 }
 0x1b5   :  { %263 = vrot.lane.b32.xlu0 %v255_v21, %s1483_s24 }
 0x21a   :  { %v259_v22 = vpop.permute.xlu1 %258 }
 0x21b   :  { %v261_v25 = vsel %vm256_vm4, %v259_v22, %v1594_v29  ;;  %v468_v22 = vrot.slane %v1632_v54, 6 }
 0x21c   :  { %356 = vrot.lane.b32.xlu0 %v261_v25, %s1483_s24 }
 0x227   :  { %v264_v26 = vpop.permute.xlu0 %263 }
 0x228   :  { %v266_v30 = vsel %vm256_vm4, %v264_v26, %v1586_v28  ;;  %v269_v28 = vrot.slane %v1632_v54, 2  ;;  %v469_v26 = vrot.slane %v1639_v61, 6  ;;  %v45_v61 = vld [vmem:[%s1838_s0 + $0x8] sm:$0xff] }
 0x229   :  { %1179 = vmatmul.mubr.msk.f32.vlgmr.msra.gmra.mrb[0].mxu1 %vm102_vm0, %v266_v30 }
 0x22a   :  { %1258 = vmatpush1.bf16.msra.mxu1 %v1554_v9  ;;  %538 = vmatprep.mubr.f32.mxu1 %v1481_v1 }
 0x22b   :  { %1260 = vmatprep.subr.bf16.mxu1 %v1557_v13 }
 0x22e   :  { %1262 = vmatpush1.bf16.msra.mxu1 %v1561_v16 }
 0x22f   :  { %1264 = vmatprep.subr.bf16.mxu1 %v1565_v18 }
 0x232   :  { %1266 = vmatpush1.bf16.msra.mxu1 %v1569_v23 }
 0x233   :  { %1268 = vmatprep.subr.bf16.mxu1 %v1573_v24 }
 0x236   :  { %1270 = vmatpush1.bf16.msra.mxu1 %v1577_v27 }
 0x237   :  { %1288 = vmatprep.subr.bf16.mxu1 %v1552_v5 }
 0x28e   :  { %v357_v46 = vpop.permute.xlu0 %356 }
 0x2fc   :  { %v342_v29 = vpop.f32.mrb[0].mxu1 }
 0x2fd   :  { %v343_v32 = vadd.f32 %v342_v29, %v269_v28  ;;  %v344_v33 = vpop.f32.mrb[1].mxu1 }
 0x2fe   :  { %v345_v34 = vadd.f32 %v344_v33, %v270_v31 }
 0x2ff   :  { %v347_v35 = vmul.f32 0.5, %v343_v32 }
 0x300   :  { %v348_v38 = vmul.f32 %v345_v34, %v1641_v63 }
 0x301   :  { %1381 = vtanh.f32 %v347_v35 }
 0x302   :  { %1383 = vtanh.f32 %v348_v38 }
 0x30b   :  { %v1382_v39 = vpop.eup %1381 }
 0x30c   :  { %v1384_v40 = vpop.eup %1383  ;;  %v351_v41 = vmul.f32 0.5, %v1382_v39 }
 0x30d   :  { %v352_v42 = vmul.f32 %v1384_v40, %v1641_v63 }
 0x30e   :  { %v353_v43 = vadd.f32 0.5, %v351_v41 }
 0x30f   :  { %v354_v44 = vadd.f32 %v352_v42, %v1645_v7 }
 0x310   :  { %v359_v48 = vmul.f32 %v357_v46, %v353_v43 }
 0x311   :  { %v360_v45 = vmul.f32 %v354_v44, %v353_v43 }
 0x313   :  { %362 = vrot.lane.b32.xlu1 %v360_v45, %s1483_s24 }
 0x385   :  { %v363_v49 = vpop.permute.xlu1 %362 }
 0x386   :  { %v365_v50 = vadd.f32 %v363_v49, %v359_v48 }
 0x388   :  { %1385 = vtanh.f32 %v365_v50 }
 0x392   :  { %v1386_v51 = vpop.eup %1385 }
 0x393   :  { %v1671_v52 = vmul.f32 %v1386_v51, %v354_v44 }
 0x395   :  { %369 = vrot.lane.b32.xlu0 %v1671_v52, %s1483_s24 }
 0x407   :  { %v370_v55 = vpop.permute.xlu0 %369 }
 0x408   :  { %1180 = vmatmul.mubr.msk.f32.vlgmr.msra.gmra.mrb[2].mxu0 %vm102_vm0, %v370_v55 }
 0x409   :  { %1274 = vmatpush1.bf16.msra.mxu0 %v1554_v9  ;;  %631 = vmatprep.mubr.f32.mxu0 %v1481_v1 }
 0x40a   :  { %1276 = vmatprep.subr.bf16.mxu0 %v1557_v13 }
 0x40d   :  { %1278 = vmatpush1.bf16.msra.mxu0 %v1561_v16 }
 0x40e   :  { %1280 = vmatprep.subr.bf16.mxu0 %v1565_v18 }
 0x411   :  { %1282 = vmatpush1.bf16.msra.mxu0 %v1569_v23 }
 0x412   :  { %1284 = vmatprep.subr.bf16.mxu0 %v1573_v24 }
 0x415   :  { %1286 = vmatpush1.bf16.msra.mxu0 %v1577_v27 }
 0x416   :  { %1304 = vmatprep.subr.bf16.mxu0 %v1552_v5 }
 0x4db   :  { %v443_v57 = vpop.f32.mrb[2].mxu0 }
 0x4dc   :  { %v444_v59 = vadd.f32 %v443_v57, %v371_v56  ;;  %v445_v60 = vpop.f32.mrb[3].mxu0 }
 0x4dd   :  { %v446_v62 = vadd.f32 %v445_v60, %v372_v58 }
 0x4de   :  { %v448_v0 = vmul.f32 0.5, %v444_v59 }
 0x4df   :  { %v449_v2 = vmul.f32 %v446_v62, %v1641_v63 }
 0x4e0   :  { %1387 = vtanh.f32 %v448_v0 }
 0x4e1   :  { %1389 = vtanh.f32 %v449_v2 }
 0x4ea   :  { %v1388_v3 = vpop.eup %1387 }
 0x4eb   :  { %v1390_v4 = vpop.eup %1389  ;;  %v452_v6 = vmul.f32 0.5, %v1388_v3 }
 0x4ec   :  { %v453_v8 = vmul.f32 %v1390_v4, %v1641_v63 }
 0x4ed   :  { %v454_v10 = vadd.f32 0.5, %v452_v6 }
 0x4ee   :  { %v455_v11 = vadd.f32 %v453_v8, %v1645_v7 }
 0x4ef   :  { %v456_v14 = vmul.f32 %v454_v10, %v365_v50 }
 0x4f0   :  { %v457_v12 = vmul.f32 %v455_v11, %v454_v10 }
 0x4f2   :  { %459 = vrot.lane.b32.xlu1 %v457_v12, %s1483_s24 }
 0x564   :  { %v460_v15 = vpop.permute.xlu1 %459 }
 0x565   :  { %v462_v17 = vadd.f32 %v460_v15, %v456_v14 }
 0x567   :  { %1391 = vtanh.f32 %v462_v17 }
 0x571   :  { %v1392_v19 = vpop.eup %1391 }
 0x572   :  { %v464_v20 = vmul.f32 %v1392_v19, %v455_v11 }
 0x574   :  { %466 = vrot.lane.b32.xlu0 %v464_v20, %s1483_s24  ;;  %v1041_v45 = vrot.slane %v464_v20, 6 }
 0x576   :  { %v1055_v49 = vsel %vm1054_vm5, %v1671_v52, %v1041_v45 }
 0x5e6   :  { %v467_v21 = vpop.permute.xlu0 %466 }
 0x5e7   :  { %1181 = vmatmul.mubr.msk.f32.vlgmr.msra.gmra.mrb[2].mxu1 %vm102_vm0, %v467_v21 }
 0x5e8   :  { %1290 = vmatpush1.bf16.msra.mxu1 %v1554_v9  ;;  %730 = vmatprep.mubr.f32.mxu1 %v1481_v1 }
 0x5e9   :  { %1292 = vmatprep.subr.bf16.mxu1 %v1557_v13 }
 0x5ec   :  { %1294 = vmatpush1.bf16.msra.mxu1 %v1561_v16 }
 0x5ed   :  { %1296 = vmatprep.subr.bf16.mxu1 %v1565_v18 }
 0x5f0   :  { %1298 = vmatpush1.bf16.msra.mxu1 %v1569_v23 }
 0x5f1   :  { %1300 = vmatprep.subr.bf16.mxu1 %v1573_v24 }
 0x5f4   :  { %1302 = vmatpush1.bf16.msra.mxu1 %v1577_v27 }
 0x5f5   :  { %1320 = vmatprep.subr.bf16.mxu1 %v1552_v5 }
 0x6ba   :  { %v540_v25 = vpop.f32.mrb[2].mxu1 }
 0x6bb   :  { %v541_v30 = vadd.f32 %v540_v25, %v468_v22  ;;  %v542_v28 = vpop.f32.mrb[3].mxu1 }
 0x6bc   :  { %v543_v29 = vadd.f32 %v542_v28, %v469_v26 }
 0x6bd   :  { %v545_v31 = vmul.f32 0.5, %v541_v30 }
 0x6be   :  { %v546_v32 = vmul.f32 %v543_v29, %v1641_v63 }
 0x6bf   :  { %1393 = vtanh.f32 %v545_v31 }
 0x6c0   :  { %1395 = vtanh.f32 %v546_v32 }
 0x6c9   :  { %v1394_v33 = vpop.eup %1393 }
 0x6ca   :  { %v1396_v34 = vpop.eup %1395  ;;  %v549_v35 = vmul.f32 0.5, %v1394_v33 }
 0x6cb   :  { %v550_v38 = vmul.f32 %v1396_v34, %v1641_v63 }
 0x6cc   :  { %v551_v39 = vadd.f32 0.5, %v549_v35 }
 0x6cd   :  { %v552_v40 = vadd.f32 %v550_v38, %v1645_v7 }
 0x6ce   :  { %v553_v41 = vmul.f32 %v551_v39, %v462_v17 }
 0x6cf   :  { %v554_v54 = vmul.f32 %v552_v40, %v551_v39 }
 0x6d1   :  { %556 = vrot.lane.b32.xlu1 %v554_v54, %s1483_s24 }
 0x6d5   :  { %54 = vperm.xlu1 %1374, %v45_v61  }
 0x743   :  { %v557_v42 = vpop.permute.xlu1 %556 }
 0x744   :  { %v559_v43 = vadd.f32 %v557_v42, %v553_v41 }
 0x746   :  { %1397 = vtanh.f32 %v559_v43 }
 0x750   :  { %v1398_v44 = vpop.eup %1397 }
 0x751   :  { %v561_v46 = vmul.f32 %v1398_v44, %v552_v40 }
 0x753   :  { %563 = vrot.lane.b32.xlu0 %v561_v46, %s1483_s24  ;;  %v1043_v48 = vrot.slane %v561_v46, 4 }
 0x754   :  { %v55_v52 = vpop.permute.xlu1 %54 }
 0x755   :  { %v1057_v50 = vsel %vm1056_vm6, %v1055_v49, %v1043_v48  ;;  %v62_v55 = vmul.f32 %v1612_v36, %v55_v52 }
 0x757   :  { %68 = vperm.xlu0 %1373, %v45_v61  }
 0x7c5   :  { %v564_v51 = vpop.permute.xlu0 %563 }
 0x7c6   :  { %1182 = vmatmul.mubr.msk.f32.vlgmr.msra.gmra.mrb[4].mxu0 %vm102_vm0, %v564_v51 }
 0x7c7   :  { %1306 = vmatpush1.bf16.msra.mxu0 %v1554_v9  ;;  %827 = vmatprep.mubr.f32.mxu0 %v1481_v1 }
 0x7c8   :  { %1308 = vmatprep.subr.bf16.mxu0 %v1557_v13 }
 0x7cb   :  { %1310 = vmatpush1.bf16.msra.mxu0 %v1561_v16 }
 0x7cc   :  { %1312 = vmatprep.subr.bf16.mxu0 %v1565_v18 }
 0x7cf   :  { %1314 = vmatpush1.bf16.msra.mxu0 %v1569_v23 }
 0x7d0   :  { %1316 = vmatprep.subr.bf16.mxu0 %v1573_v24 }
 0x7d3   :  { %1318 = vmatpush1.bf16.msra.mxu0 %v1577_v27 }
 0x7d4   :  { %1336 = vmatprep.subr.bf16.mxu0 %v1552_v5 }
 0x7d6   :  { %v69_v56 = vpop.permute.xlu0 %68 }
 0x7d7   :  { %v76_v57 = vmul.f32 %v1614_v37, %v69_v56 }
 0x7d9   :  { %v78_v58 = vadd.f32 %v76_v57, %v62_v55 }
 0x7db   :  { %83 = vrot.lane.b32.xlu0 %v78_v58, %s1484_s25  ;;  %89 = vrot.lane.b32.xlu1 %v78_v58, %s1483_s24  ;;  %v101_v0 = vsel %vm99_vm1, %v78_v58, 0.0 }
 0x7df   :  { %95 = vrot.lane.b32.xlu1 %v78_v58, %s1485_s26 }
 0x84d   :  { %v90_v59 = vpop.permute.xlu1 %89  ;;  %v84_v60 = vpop.permute.xlu0 %83 }
 0x84e   :  { %v104_v2 = vsel %vm102_vm0, %v101_v0, %v84_v60  ;;  %v109_v5 = vsel %vm99_vm1, %v90_v59, 0.0 }
 0x84f   :  { %v107_v37 = vsel %vm105_vm2, %v104_v2, 0.0 }
 0x850   :  { %v1737_v4 = vadd.f32 %v1624_v47, %v107_v37 }
 0x851   :  { %v96_v62 = vpop.permute.xlu1 %95 }
 0x852   :  { %v111_v36 = vsel %vm102_vm0, %v109_v5, %v96_v62  ;;  %v660_v38 = vrot.slane %v1737_v4, 2  ;;  %v757_v60 = vrot.slane %v1737_v4, 4 }
 0x853   :  { %v113_v3 = vsel %vm105_vm2, %v111_v36, 0.0 }
 0x854   :  { %v1740_v6 = vadd.f32 %v1629_v53, %v113_v3 }
 0x856   :  { %v661_v40 = vrot.slane %v1740_v6, 2  ;;  %v758_v0 = vrot.slane %v1740_v6, 4 }
 0x899   :  { %v633_v8 = vpop.f32.mrb[4].mxu0 }
 0x89a   :  { %v634_v10 = vadd.f32 %v633_v8, %v1737_v4  ;;  %v635_v11 = vpop.f32.mrb[5].mxu0 }
 0x89b   :  { %v636_v12 = vadd.f32 %v635_v11, %v1740_v6 }
 0x89c   :  { %v638_v14 = vmul.f32 0.5, %v634_v10 }
 0x89d   :  { %v639_v15 = vmul.f32 %v636_v12, %v1641_v63 }
 0x89e   :  { %1399 = vtanh.f32 %v638_v14 }
 0x89f   :  { %1401 = vtanh.f32 %v639_v15  ;;  %v854_v15 = vrot.slane %v1737_v4, 6 }
 0x8a8   :  { %v1400_v17 = vpop.eup %1399 }
 0x8a9   :  { %v1402_v19 = vpop.eup %1401  ;;  %v642_v20 = vmul.f32 0.5, %v1400_v17 }
 0x8aa   :  { %v643_v21 = vmul.f32 %v1402_v19, %v1641_v63  ;;  %v855_v19 = vrot.slane %v1740_v6, 6 }
 0x8ab   :  { %v644_v22 = vadd.f32 0.5, %v642_v20 }
 0x8ac   :  { %v645_v25 = vadd.f32 %v643_v21, %v1645_v7 }
 0x8ad   :  { %v646_v30 = vmul.f32 %v644_v22, %v559_v43 }
 0x8ae   :  { %v647_v26 = vmul.f32 %v645_v25, %v644_v22 }
 0x8b0   :  { %649 = vrot.lane.b32.xlu0 %v647_v26, %s1483_s24 }
 0x922   :  { %v650_v28 = vpop.permute.xlu0 %649 }
 0x923   :  { %v652_v29 = vadd.f32 %v650_v28, %v646_v30 }
 0x925   :  { %1403 = vtanh.f32 %v652_v29 }
 0x92f   :  { %v1404_v31 = vpop.eup %1403 }
 0x930   :  { %v654_v32 = vmul.f32 %v1404_v31, %v645_v25 }
 0x932   :  { %656 = vrot.lane.b32.xlu1 %v654_v32, %s1483_s24  ;;  %v1045_v33 = vrot.slane %v654_v32, 2 }
 0x934   :  { %v1750_v34 = vsel %vm1058_vm7, %v1057_v50, %v1045_v33 }
 0x9a4   :  { %v657_v35 = vpop.permute.xlu1 %656 }
 0x9a5   :  { %1183 = vmatmul.mubr.msk.f32.vlgmr.msra.gmra.mrb[4].mxu1 %vm102_vm0, %v657_v35 }
 0x9a6   :  { %1322 = vmatpush1.bf16.msra.mxu1 %v1554_v9  ;;  %924 = vmatprep.mubr.f32.mxu1 %v1481_v1 }
 0x9a7   :  { %1324 = vmatprep.subr.bf16.mxu1 %v1557_v13 }
 0x9aa   :  { %1326 = vmatpush1.bf16.msra.mxu1 %v1561_v16 }
 0x9ab   :  { %1328 = vmatprep.subr.bf16.mxu1 %v1565_v18 }
 0x9ae   :  { %1330 = vmatpush1.bf16.msra.mxu1 %v1569_v23 }
 0x9af   :  { %1332 = vmatprep.subr.bf16.mxu1 %v1573_v24 }
 0x9b2   :  { %1334 = vmatpush1.bf16.msra.mxu1 %v1577_v27 }
 0xa78   :  { %v732_v39 = vpop.f32.mrb[4].mxu1 }
 0xa79   :  { %v733_v54 = vadd.f32 %v732_v39, %v660_v38  ;;  %v734_v61 = vpop.f32.mrb[5].mxu1 }
 0xa7a   :  { %v735_v41 = vadd.f32 %v734_v61, %v661_v40 }
 0xa7b   :  { %v737_v42 = vmul.f32 0.5, %v733_v54 }
 0xa7c   :  { %v738_v43 = vmul.f32 %v735_v41, %v1641_v63 }
 0xa7d   :  { %1405 = vtanh.f32 %v737_v42 }
 0xa7e   :  { %1407 = vtanh.f32 %v738_v43 }
 0xa87   :  { %v1406_v44 = vpop.eup %1405 }
 0xa88   :  { %v1408_v45 = vpop.eup %1407  ;;  %v741_v46 = vmul.f32 0.5, %v1406_v44 }
 0xa89   :  { %v742_v48 = vmul.f32 %v1408_v45, %v1641_v63 }
 0xa8a   :  { %v743_v49 = vadd.f32 0.5, %v741_v46 }
 0xa8b   :  { %v744_v50 = vadd.f32 %v742_v48, %v1645_v7 }
 0xa8c   :  { %v745_v52 = vmul.f32 %v743_v49, %v652_v29 }
 0xa8d   :  { %v746_v51 = vmul.f32 %v744_v50, %v743_v49 }
 0xa8f   :  { %748 = vrot.lane.b32.xlu0 %v746_v51, %s1483_s24 }
 0xb01   :  { %v749_v55 = vpop.permute.xlu0 %748 }
 0xb02   :  { %v751_v56 = vadd.f32 %v749_v55, %v745_v52 }
 0xb04   :  { %1409 = vtanh.f32 %v751_v56 }
 0xb0e   :  { %v1410_v57 = vpop.eup %1409 }
 0xb0f   :  { %v1767_v58 = vmul.f32 %v1410_v57, %v744_v50 }
 0xb11   :  { %755 = vrot.lane.b32.xlu1 %v1767_v58, %s1483_s24 }
 0xb83   :  { %v756_v59 = vpop.permute.xlu1 %755 }
 0xb84   :  { %1184 = vmatmul.mubr.msk.f32.vlgmr.msra.gmra.mrb[6].mxu0 %vm102_vm0, %v756_v59 }
 0xb85   :  { %1338 = vmatpush1.bf16.msra.mxu0 %v1554_v9  ;;  %1017 = vmatprep.mubr.f32.mxu0 %v1481_v1 }
 0xb86   :  { %1340 = vmatprep.subr.bf16.mxu0 %v1557_v13 }
 0xb89   :  { %1342 = vmatpush1.bf16.msra.mxu0 %v1561_v16 }
 0xb8a   :  { %1344 = vmatprep.subr.bf16.mxu0 %v1565_v18 }
 0xb8d   :  { %1346 = vmatpush1.bf16.msra.mxu0 %v1569_v23 }
 0xb8e   :  { %1348 = vmatprep.subr.bf16.mxu0 %v1573_v24 }
 0xb91   :  { %1350 = vmatpush1.bf16.msra.mxu0 %v1577_v27 }
 0xc57   :  { %v829_v62 = vpop.f32.mrb[6].mxu0 }
 0xc58   :  { %v830_v9 = vadd.f32 %v829_v62, %v757_v60  ;;  %v831_v2 = vpop.f32.mrb[7].mxu0  ;;  %v1065_v60 = vld [vmem:[%s1844_s6 + $0x10] sm:$0xff] }
 0xc59   :  { %v832_v1 = vadd.f32 %v831_v2, %v758_v0 }
 0xc5a   :  { %v834_v5 = vmul.f32 0.5, %v830_v9 }
 0xc5b   :  { %v835_v13 = vmul.f32 %v832_v1, %v1641_v63 }
 0xc5c   :  { %1411 = vtanh.f32 %v834_v5 }
 0xc5d   :  { %1413 = vtanh.f32 %v835_v13 }
 0xc66   :  { %v1412_v16 = vpop.eup %1411 }
 0xc67   :  { %v1414_v18 = vpop.eup %1413  ;;  %v838_v23 = vmul.f32 0.5, %v1412_v16 }
 0xc68   :  { %v839_v24 = vmul.f32 %v1414_v18, %v1641_v63 }
 0xc69   :  { %v840_v36 = vadd.f32 0.5, %v838_v23  ;;  %v1187_v23 = vld [vmem:[%s1845_s7] ss:$0 sm:$0xff] }
 0xc6a   :  { %v841_v27 = vadd.f32 %v839_v24, %v1645_v7 }
 0xc6b   :  { %v842_v3 = vmul.f32 %v840_v36, %v751_v56 }
 0xc6c   :  { %v843_v37 = vmul.f32 %v841_v27, %v840_v36 }
 0xc6e   :  { %845 = vrot.lane.b32.xlu0 %v843_v37, %s1483_s24 }
 0xce0   :  { %v846_v8 = vpop.permute.xlu0 %845 }
 0xce1   :  { %v848_v10 = vadd.f32 %v846_v8, %v842_v3 }
 0xce3   :  { %1415 = vtanh.f32 %v848_v10 }
 0xced   :  { %v1416_v11 = vpop.eup %1415 }
 0xcee   :  { %v850_v12 = vmul.f32 %v1416_v11, %v841_v27 }
 0xcf0   :  { %852 = vrot.lane.b32.xlu1 %v850_v12, %s1483_s24  ;;  %v1047_v40 = vrot.slane %v850_v12, 6 }
 0xcf2   :  { %v1060_v41 = vsel %vm1054_vm5, %v1767_v58, %v1047_v40 }
 0xd62   :  { %v853_v14 = vpop.permute.xlu1 %852 }
 0xd63   :  { %1185 = vmatmul.mubr.msk.f32.vlgmr.msra.gmra.mrb[6].mxu1 %vm102_vm0, %v853_v14 }
 0xe36   :  { %v926_v17 = vpop.f32.mrb[6].mxu1 }
 0xe37   :  { %v927_v20 = vadd.f32 %v926_v17, %v854_v15  ;;  %v928_v21 = vpop.f32.mrb[7].mxu1 }
 0xe38   :  { %v929_v22 = vadd.f32 %v928_v21, %v855_v19 }
 0xe39   :  { %v931_v25 = vmul.f32 0.5, %v927_v20 }
 0xe3a   :  { %v932_v26 = vmul.f32 %v929_v22, %v1641_v63 }
 0xe3b   :  { %1417 = vtanh.f32 %v931_v25 }
 0xe3c   :  { %1419 = vtanh.f32 %v932_v26 }
 0xe45   :  { %v1418_v30 = vpop.eup %1417 }
 0xe46   :  { %v1420_v28 = vpop.eup %1419  ;;  %v935_v29 = vmul.f32 0.5, %v1418_v30 }
 0xe47   :  { %v936_v31 = vmul.f32 %v1420_v28, %v1641_v63 }
 0xe48   :  { %v937_v32 = vadd.f32 0.5, %v935_v29 }
 0xe49   :  { %v938_v33 = vadd.f32 %v936_v31, %v1645_v7 }
 0xe4a   :  { %v939_v6 = vmul.f32 %v937_v32, %v848_v10 }
 0xe4b   :  { %v940_v4 = vmul.f32 %v938_v33, %v937_v32 }
 0xe4d   :  { %942 = vrot.lane.b32.xlu0 %v940_v4, %s1483_s24 }
 0xebf   :  { %v943_v35 = vpop.permute.xlu0 %942 }
 0xec0   :  { %v945_v38 = vadd.f32 %v943_v35, %v939_v6 }
 0xec2   :  { %1421 = vtanh.f32 %v945_v38 }
 0xecc   :  { %v1422_v39 = vpop.eup %1421 }
 0xecd   :  { %v947_v54 = vmul.f32 %v1422_v39, %v938_v33 }
 0xecf   :  { %949 = vrot.lane.b32.xlu1 %v947_v54, %s1483_s24  ;;  %v1049_v61 = vrot.slane %v947_v54, 4 }
 0xed1   :  { %v1061_v42 = vsel %vm1056_vm6, %v1060_v41, %v1049_v61 }
 0xed3   :  { %1076 = vrot.lane.b32.xlu1 %v1750_v34, %s1484_s25 }
 0xf41   :  { %v950_v43 = vpop.permute.xlu1 %949 }
 0xf42   :  { %1186 = vmatmul.mubr.msk.f32.vlgmr.msra.gmra.mrb[8].mxu0 %vm102_vm0, %v950_v43 }
 0xf45   :  { %v1077_v44 = vpop.permute.xlu1 %1076 }
 0xf46   :  { %1204 = vmatprep.mubr.msk.f32.mxu1 %vm99_vm1, %v1077_v44 }
0x1015   :  { %v1019_v45 = vpop.f32.mrb[8].mxu0 }
0x1016   :  { %v1020_v46 = vadd.f32 %v1019_v45, %v1624_v47  ;;  %v1021_v48 = vpop.f32.mrb[9].mxu0  ;;  %v1063_v47 = vld [vmem:[%s1844_s6] sm:$0xff] }
0x1017   :  { %v1022_v49 = vadd.f32 %v1021_v48, %v1629_v53  ;;  %v1064_v53 = vld [vmem:[%s1844_s6 + $0x8] sm:$0xff] }
0x1018   :  { %v1024_v50 = vmul.f32 0.5, %v1020_v46  ;;  %v1351_v62 = vpack.c.bf16 %v1064_v53, %v1063_v47 }
0x1019   :  { %v1025_v51 = vmul.f32 %v1022_v49, %v1641_v63 }
0x101a   :  { %1423 = vtanh.f32 %v1024_v50  ;;  %1352 = vmatprep.subr.bf16.mxu1 %v1351_v62 }
0x101b   :  { %1425 = vtanh.f32 %v1025_v51  ;;  %1354 = vmatpush3.bf16.msra.mxu1 %v1351_v62 }
0x1024   :  { %v1424_v52 = vpop.eup %1423 }
0x1025   :  { %v1426_v55 = vpop.eup %1425  ;;  %v1028_v34 = vmul.f32 0.5, %v1424_v52 }
0x1026   :  { %v1029_v56 = vmul.f32 %v1426_v55, %v1641_v63  ;;  %v1066_v63 = vld [vmem:[%s1844_s6 + $0x18] sm:$0xff] }
0x1027   :  { %v1030_v57 = vadd.f32 0.5, %v1028_v34 }
0x1028   :  { %v1031_v58 = vadd.f32 %v1029_v56, %v1645_v7  ;;  %v1355_v7 = vpack.c.bf16 %v1066_v63, %v1065_v60 }
0x1029   :  { %v1032_v0 = vmul.f32 %v1030_v57, %v945_v38 }
0x102a   :  { %v1033_v59 = vmul.f32 %v1031_v58, %v1030_v57  ;;  %1356 = vmatprep.subr.bf16.mxu1 %v1355_v7 }
0x102b   :  { %1358 = vmatpush3.bf16.msra.mxu1 %v1355_v7 }
0x102c   :  { %1035 = vrot.lane.b32.xlu0 %v1033_v59, %s1483_s24 }
0x109e   :  { %v1036_v9 = vpop.permute.xlu0 %1035 }
0x109f   :  { %v1038_v2 = vadd.f32 %v1036_v9, %v1032_v0 }
0x10a1   :  { %1427 = vtanh.f32 %v1038_v2 }
0x10ab   :  { %v1428_v1 = vpop.eup %1427 }
0x10ac   :  { %v1040_v5 = vmul.f32 %v1428_v1, %v1031_v58 }
0x10ae   :  { %v1052_v13 = vrot.slane %v1040_v5, 2 }
0x10b0   :  { %v1062_v16 = vsel %vm1058_vm7, %v1061_v42, %v1052_v13 }
0x10b1   :  { %1078 = vrot.lane.b32.xlu0 %v1062_v16, %s1484_s25 }
0x1123   :  { %v1079_v18 = vpop.permute.xlu0 %1078 }
0x1124   :  { %1205 = vmatmul.mubr.msk.f32.vlgmr.msra.gmra.mrb[8].mxu1 %vm99_vm1, %v1079_v18 }
0x11f7   :  { %v1206_v24 = vpop.f32.mrb[8].mxu1 }
0x11f8   :  { %v1156_v36 = vadd.f32 %v1206_v24, %v1187_v23  ;;  %v1150_v27 = vpop.f32.mrb[9].mxu1 }
0x11f9   :  { %v1151_v37 = vadd.f32 %v1187_v23, %v1150_v27 }
0x11fa   :  { %1160 = vst [vmem:[#allocation5 + $0x8] sm:$0xff] %v1156_v36 }
0x11fb   :  { %1159 = vst [vmem:[#allocation5] sm:$0xff] %v1151_v37 }
0x11fc   :  { %1462 = shalt.err (!%p1459_p12)
}
0x11fd   :  { %s1463_s7 = scalar_lea.hbm %s1846_s8, 256 }
0x11fe   :  { %p1464_p13 = scmp.ne.s32.totalorder %s1846_s8, %s1463_s7  ;;  %p1467_p0 = scmp.lt.u32.totalorder %s1463_s7, %s1846_s8 }
0x1200   :  { %p1469_p1 = pnand %p1467_p0, %p1464_p13 }
0x1202   :  { %1472 = shalt.err (!%p1469_p1)
}
0x1203   :  { %s1488_s23 = smov 128   ;;  %s1489_s24 = smov 8  }
0x1204   :  { %1172 = dma.vmem_to_hbm [thread:$0]  %s1167_s16, 256, %s1846_s8, [#allocation4], %s1488_s23, %s1488_s23, %s1489_s24  }
0x1205   :  { %1475 = dma.done.wait [#allocation4], 256  }
0x1206   :  { %1476 = vsyncadd [#allocation4], 4294967040 }
0x1207   :  { %1176 = vsyncpa [#allocation3], 1 }
0x1208   :  { %1177 = vsyncpa [#allocation4], 1 }

</bundles_post_ra>
